<compile_context>
chip_gen: v7x
topology: tpu7x:2x2x1
jax: 0.10.0
libtpu: 0.0.40
codegen_flags: <defaults>
</compile_context>

<pallas_src>
import functools

import jax
import jax.numpy as jnp
from jax.experimental import pallas as pl
from jax.experimental.pallas import tpu as pltpu

LANE = 128  # TPU lane width; fc2 output is zero-padded to a multiple of this.


def dqn_kernel(x_ref, w1_ref, b1_ref, w2_ref, b2_ref, out_ref):
    # fc1: bf16 operands on the MXU, f32 accumulate.
    h = jnp.dot(x_ref[...], w1_ref[...], preferred_element_type=jnp.float32)
    # Bias + ReLU epilogue in f32.
    h = jnp.maximum(h + b1_ref[...], 0.0)
    # fc2: single intended down-cast to the MXU dtype, f32 accumulate.
    q = jnp.dot(h.astype(w2_ref.dtype), w2_ref[...],
                preferred_element_type=jnp.float32)
    # Lane-dense (TM, 128) f32 store -> unmasked full-tile vst.
    out_ref[...] = q + b2_ref[...]


@functools.partial(jax.jit, static_argnames=("tm",))
def dqn_forward(x, w1, b1, w2, b2, *, tm=128):
    """x: [B, state_dim] f32; returns [B, action_dim] f32 Q-values."""
    batch, state_dim = x.shape
    hidden = w1.shape[1]
    action_dim = w2.shape[1]

    # --- wrapper-side layout plumbing (not compute) ------------------------
    # 1) Lane-dense output: zero-pad fc2 to a 128-wide N.
    n_pad = ((action_dim + LANE - 1) // LANE) * LANE
    w2_p = jnp.zeros((hidden, n_pad), jnp.float32).at[:, :action_dim].set(w2)
    b2_p = jnp.zeros((1, n_pad), jnp.float32).at[:, :action_dim].set(b2)
    # 2) Batch tiling: pad batch to a multiple of TM.
    b_pad = ((batch + tm - 1) // tm) * tm
    x_p = jnp.zeros((b_pad, state_dim), x.dtype).at[:batch].set(x)
    # 3) bf16 MXU operands (halves DMA bytes, ~2x MXU rate on v6e/v7x).
    x_b = x_p.astype(jnp.bfloat16)
    w1_b = w1.astype(jnp.bfloat16)
    w2_b = w2_p.astype(jnp.bfloat16)

    grid = (b_pad // tm,)
    out_padded = pl.pallas_call(
        dqn_kernel,
        out_shape=jax.ShapeDtypeStruct((b_pad, n_pad), jnp.float32),
        grid=grid,
        in_specs=[
            pl.BlockSpec((tm, state_dim), lambda i: (i, 0)),      # x batch tile
            pl.BlockSpec((state_dim, hidden), lambda i: (0, 0)),  # w1 (resident)
            pl.BlockSpec((1, hidden), lambda i: (0, 0)),          # b1 (resident)
            pl.BlockSpec((hidden, n_pad), lambda i: (0, 0)),      # w2 (resident)
            pl.BlockSpec((1, n_pad), lambda i: (0, 0)),           # b2 (resident)
        ],
        out_specs=pl.BlockSpec((tm, n_pad), lambda i: (i, 0)),
        compiler_params=pltpu.CompilerParams(
            dimension_semantics=("parallel",)),  # v7x: shard batch over 2 TCs
    )(x_b, w1_b, b1, w2_b, b2_p)

    return out_padded[:batch, :action_dim]


def init_dqn_params(key, state_dim, hidden_dim, action_dim):
    """Deterministic init mirroring PyTorch nn.Linear default U[-1/sqrt(in), 1/sqrt(in)]."""
    k1, k2, k3, k4 = jax.random.split(key, 4)
    bound1 = 1.0 / jnp.sqrt(jnp.float32(state_dim))
    bound2 = 1.0 / jnp.sqrt(jnp.float32(hidden_dim))
    w1 = jax.random.uniform(k1, (state_dim, hidden_dim), jnp.float32, -bound1, bound1)
    b1 = jax.random.uniform(k2, (1, hidden_dim), jnp.float32, -bound1, bound1)
    w2 = jax.random.uniform(k3, (hidden_dim, action_dim), jnp.float32, -bound2, bound2)
    b2 = jax.random.uniform(k4, (1, action_dim), jnp.float32, -bound2, bound2)
    return w1, b1, w2, b2


if __name__ == "__main__":
    state_dim = 16
    hidden_dim = 128   # fixed by the module: nn.Linear(state_dim, 128)
    action_dim = 4
    batch = 200        # not a multiple of TM=128 -> exercises grid + padding

    key = jax.random.PRNGKey(0)
    k_params, k_x = jax.random.split(key)
    w1, b1, w2, b2 = init_dqn_params(k_params, state_dim, hidden_dim, action_dim)
    x = jax.random.normal(k_x, (batch, state_dim), jnp.float32)

    q = dqn_forward(x, w1, b1, w2, b2)
    q = jax.block_until_ready(q)
    assert q.shape == (batch, action_dim)

    # Reference with the same bf16-operand / f32-accumulate math in plain JAX.
    h_ref = jnp.maximum(
        jnp.dot(x.astype(jnp.bfloat16), w1.astype(jnp.bfloat16),
                preferred_element_type=jnp.float32) + b1, 0.0)
    ref = jnp.dot(h_ref.astype(jnp.bfloat16), w2.astype(jnp.bfloat16),
                  preferred_element_type=jnp.float32) + b2
    assert jnp.allclose(q, ref, atol=1e-2, rtol=1e-2)

    # Sanity vs full-f32 math (only bf16 quantization error expected).
    ref_f32 = jnp.maximum(x @ w1 + b1, 0.0) @ w2 + b2
    assert jnp.allclose(q, ref_f32, atol=5e-2, rtol=5e-2)

    print("KERNEL_OK")
</pallas_src>

<mosaic_0001>
module attributes {stable_mosaic.version = 11 : i64} {
  func.func @dqn_kernel(%arg0: i32, %arg1: memref<128x16xbf16, #tpu.memory_space<vmem>>, %arg2: memref<16x128xbf16, #tpu.memory_space<vmem>>, %arg3: memref<1x128xf32, #tpu.memory_space<vmem>>, %arg4: memref<128x128xbf16, #tpu.memory_space<vmem>>, %arg5: memref<1x128xf32, #tpu.memory_space<vmem>>, %arg6: memref<128x128xf32, #tpu.memory_space<vmem>>) attributes {dimension_semantics = [#tpu.dimension_semantics<parallel>], iteration_bounds = array<i64: 2>, scalar_prefetch = 0 : i64, scratch_operands = 0 : i64, tpu.core_type = #tpu.core_type<tc>, window_params = [{transform_indices = @transform_0, window_bounds = array<i64: 128, 16>}, {pipeline_mode = #tpu.pipeline_mode<synchronous>, transform_indices = @transform_1, window_bounds = array<i64: 16, 128>}, {pipeline_mode = #tpu.pipeline_mode<synchronous>, transform_indices = @transform_2, window_bounds = array<i64: 1, 128>}, {pipeline_mode = #tpu.pipeline_mode<synchronous>, transform_indices = @transform_3, window_bounds = array<i64: 128, 128>}, {pipeline_mode = #tpu.pipeline_mode<synchronous>, transform_indices = @transform_4, window_bounds = array<i64: 1, 128>}, {transform_indices = @transform_5, window_bounds = array<i64: 128, 128>}]} {
    %c0 = arith.constant 0 : index
    %c0_0 = arith.constant 0 : index
    %0 = vector.load %arg1[%c0, %c0_0] : memref<128x16xbf16, #tpu.memory_space<vmem>>, vector<128x16xbf16>
    %c0_1 = arith.constant 0 : index
    %c0_2 = arith.constant 0 : index
    %1 = vector.load %arg2[%c0_1, %c0_2] : memref<16x128xbf16, #tpu.memory_space<vmem>>, vector<16x128xbf16>
    %cst = arith.constant dense<0.000000e+00> : vector<128x128xf32>
    %2 = tpu.matmul %0, %1, %cst {dimension_numbers = #tpu.dot_dimension_numbers<[1], [0], [0], [1], [0, 0, 1, 1], [], []>} : vector<128x16xbf16>, vector<16x128xbf16>, vector<128x128xf32> -> vector<128x128xf32>
    %c0_3 = arith.constant 0 : index
    %c0_4 = arith.constant 0 : index
    %3 = vector.load %arg3[%c0_3, %c0_4] : memref<1x128xf32, #tpu.memory_space<vmem>>, vector<1x128xf32>
    %4 = vector.broadcast %3 : vector<1x128xf32> to vector<128x128xf32>
    %5 = arith.addf %2, %4 : vector<128x128xf32>
    %cst_5 = arith.constant 0.000000e+00 : f32
    %6 = vector.broadcast %cst_5 : f32 to vector<128x128xf32>
    %7 = arith.maximumf %5, %6 : vector<128x128xf32>
    %8 = arith.truncf %7 : vector<128x128xf32> to vector<128x128xbf16>
    %c0_6 = arith.constant 0 : index
    %c0_7 = arith.constant 0 : index
    %9 = vector.load %arg4[%c0_6, %c0_7] : memref<128x128xbf16, #tpu.memory_space<vmem>>, vector<128x128xbf16>
    %cst_8 = arith.constant dense<0.000000e+00> : vector<128x128xf32>
    %10 = tpu.matmul %8, %9, %cst_8 {dimension_numbers = #tpu.dot_dimension_numbers<[1], [0], [0], [1], [0, 0, 1, 1], [], []>} : vector<128x128xbf16>, vector<128x128xbf16>, vector<128x128xf32> -> vector<128x128xf32>
    %c0_9 = arith.constant 0 : index
    %c0_10 = arith.constant 0 : index
    %11 = vector.load %arg5[%c0_9, %c0_10] : memref<1x128xf32, #tpu.memory_space<vmem>>, vector<1x128xf32>
    %12 = vector.broadcast %11 : vector<1x128xf32> to vector<128x128xf32>
    %13 = arith.addf %10, %12 : vector<128x128xf32>
    %c0_11 = arith.constant 0 : index
    %c0_12 = arith.constant 0 : index
    %14 = vector.load %arg6[%c0_11, %c0_12] : memref<128x128xf32, #tpu.memory_space<vmem>>, vector<128x128xf32>
    tpu.vector_store %arg6[%c0_11, %c0_12], %13 {strides = array<i32>} : memref<128x128xf32, #tpu.memory_space<vmem>>, vector<128x128xf32>,
    return
  }
  func.func @transform_0(%arg0: i32) -> (i32, i32) {
    %c0_i32 = arith.constant 0 : i32
    %c0_i32_0 = arith.constant 0 : i32
    return %arg0, %c0_i32 : i32, i32
  }
  func.func @transform_1(%arg0: i32) -> (i32, i32) {
    %c0_i32 = arith.constant 0 : i32
    %c0_i32_0 = arith.constant 0 : i32
    %c0_i32_1 = arith.constant 0 : i32
    return %c0_i32, %c0_i32_0 : i32, i32
  }
  func.func @transform_2(%arg0: i32) -> (i32, i32) {
    %c0_i32 = arith.constant 0 : i32
    %c0_i32_0 = arith.constant 0 : i32
    %c0_i32_1 = arith.constant 0 : i32
    return %c0_i32, %c0_i32_0 : i32, i32
  }
  func.func @transform_3(%arg0: i32) -> (i32, i32) {
    %c0_i32 = arith.constant 0 : i32
    %c0_i32_0 = arith.constant 0 : i32
    %c0_i32_1 = arith.constant 0 : i32
    return %c0_i32, %c0_i32_0 : i32, i32
  }
  func.func @transform_4(%arg0: i32) -> (i32, i32) {
    %c0_i32 = arith.constant 0 : i32
    %c0_i32_0 = arith.constant 0 : i32
    %c0_i32_1 = arith.constant 0 : i32
    return %c0_i32, %c0_i32_0 : i32, i32
  }
  func.func @transform_5(%arg0: i32) -> (i32, i32) {
    %c0_i32 = arith.constant 0 : i32
    %c0_i32_0 = arith.constant 0 : i32
    return %arg0, %c0_i32 : i32, i32
  }
}

</mosaic_0001>

<bundles_post_ra>
// kernel: dqn_forward.1
= control target key start
LH: loop header
LB: loop body
LE: loop exit
PB: predicated region body
PF: predicated region fallthrough
CT: control target
= control target key end

     0   :  { %s878_s18 = smov 0   ;;  %s968_s0 = inlined_call_operand.vmem [shape: bf16[256,16], index: 0, kind: input, shape index: {}]   ;;  %s969_s1 = inlined_call_operand.vmem [shape: bf16[16,128], index: 1, kind: input, shape index: {}]   ;;  %s970_s2 = inlined_call_operand.vmem [shape: f32[1,128], index: 2, kind: input, shape index: {}]   ;;  %s971_s3 = inlined_call_operand.vmem [shape: bf16[128,128], index: 3, kind: input, shape index: {}]   ;;  %s972_s4 = inlined_call_operand.vmem [shape: f32[1,128], index: 4, kind: input, shape index: {}]   ;;  %s973_s5 = inlined_call_operand.vmem [shape: f32[256,128], index: 5, kind: output, shape index: {}]  }
   0x1 LB: > { %s686_s19 = sadd.s32 4294967295, %s846_s18   ;;  %p690_p0 = scmp.ge.s32.totalorder %s846_s18, 1  ;;  %s846_s18 = sphi %s878_s18, %s15_s18  }
   0x2   : > { %p188_p1 = scmp.lt.s32.totalorder %s846_s18, 3 }
   0x4   : > { %p189_p2 = pnand %p690_p0, %p188_p1 }
   0x5   : > { %v823_v0 = vld [vmem:[%s969_s1] sm:$0xff] (!%p189_p2)   ;;  %s691_s22 = sshll.u32 (!%p189_p2), %s686_s19, 4  ;;  %v833_v2 = vld [vmem:[%s971_s3 + $0x8] sm:$0xff] (!%p189_p2)   ;;  %vm300_vm0 = vcmask (!%p189_p2), 130048   ;;  %v834_v3 = vld [vmem:[%s971_s3 + $0x10] sm:$0xff] (!%p189_p2)  }
   0x6   : > { %192 = sbr.rel (%p189_p2) target bundleno = 482 (0x1e2), region = 40  ;;  %p217_p3 = scmp.lt.s32.totalorder (!%p189_p2), %s691_s22, 31  ;;  %749 = vmatprep.subr.bf16.mxu0 (!%p189_p2), %v823_v0  ;;  %v832_v1 = vld [vmem:[%s971_s3] sm:$0xff] (!%p189_p2)   ;;  %v835_v7 = vld [vmem:[%s971_s3 + $0x18] sm:$0xff] (!%p189_p2)   ;;  %v837_v11 = vld [vmem:[%s971_s3 + $0x28] sm:$0xff] (!%p189_p2)  }
   0x7   : > { %750 = vmatpush3.bf16.msra.mxu0 (!%p189_p2), %v823_v0  ;;  %799 = vmatprep.subr.bf16.mxu1 (!%p189_p2), %v832_v1  ;;  %v836_v10 = vld [vmem:[%s971_s3 + $0x20] sm:$0xff] (!%p189_p2)   ;;  %v838_v15 = vld [vmem:[%s971_s3 + $0x30] sm:$0xff] (!%p189_p2)   ;;  %v839_v16 = vld [vmem:[%s971_s3 + $0x38] sm:$0xff] (!%p189_p2)  }
   0x8   : > { %767 = vmatprep.subr.bf16.mxu0 (!%p189_p2), %v832_v1  ;;  %807 = vmatpush3.bf16.msra.mxu1 (!%p189_p2), %v832_v1  ;;  %v695_v17 = vld [vmem:[%s970_s2] ss:$0 sm:$0xff] (!%p189_p2) }
   0x9   : > { %800 = vmatprep.subr.bf16.mxu1 (!%p189_p2), %v833_v2 }
   0xc   : > { %808 = vmatpush3.bf16.msra.mxu1 (!%p189_p2), %v833_v2 }
   0xd   : > { %s975_s22 = smov (!%p217_p3, %s691_s22), 31  ;;  %801 = vmatprep.subr.bf16.mxu1 %v834_v3 }
   0xe   : > { %s692_s27 = sshll.u32 %s975_s22, 2  ;;  %s694_s21 = sshll.u32 %s975_s22, 3 }
   0xf   : > { %s901_s30 = scalar_lea.vmem %s968_s0, %s692_s27  ;;  %s947_s27 = scalar_lea.vmem %s973_s5, %s694_s21 }
  0x10   : > { %v824_v4 = vld [vmem:[%s901_s30] sm:$0xff]   ;;  %v825_v5 = vld [vmem:[%s901_s30 + $0x8] sm:$0xff]   ;;  %v826_v6 = vld [vmem:[%s901_s30 + $0x10] sm:$0xff]   ;;  %809 = vmatpush3.bf16.msra.mxu1 %v834_v3 }
  0x11   : > { %751 = vmatprep.mubr.msk.bf16.mxu0 %vm300_vm0, %v824_v4  ;;  %v827_v8 = vld [vmem:[%s901_s30 + $0x18] sm:$0xff]   ;;  %802 = vmatprep.subr.bf16.mxu1 %v835_v7  ;;  %v828_v9 = vld [vmem:[%s901_s30 + $0x20] sm:$0xff]   ;;  %v829_v12 = vld [vmem:[%s901_s30 + $0x28] sm:$0xff]  }
  0x12   : > { %752 = vmatmul.mubr.msk.bf16.vlgmr.msra.gmra.mrb[0].mxu0 %vm300_vm0, %v825_v5  ;;  %v830_v13 = vld [vmem:[%s901_s30 + $0x30] sm:$0xff]   ;;  %v831_v14 = vld [vmem:[%s901_s30 + $0x38] sm:$0xff]  }
  0x13   : > { %755 = vmatprep.mubr.msk.bf16.mxu0 %vm300_vm0, %v826_v6  ;;  %768 = vmatpush3.bf16.msra.mxu0 %v832_v1 }
  0x14   : > { %769 = vmatprep.subr.bf16.mxu0 %v833_v2  ;;  %810 = vmatpush3.bf16.msra.mxu1 %v835_v7 }
  0x15   : > { %803 = vmatprep.subr.bf16.mxu1 %v836_v10 }
  0x17   : > { %770 = vmatpush3.bf16.msra.mxu0 %v833_v2 }
  0x18   : > { %771 = vmatprep.subr.bf16.mxu0 %v834_v3  ;;  %811 = vmatpush3.bf16.msra.mxu1 %v836_v10 }
  0x19   : > { %804 = vmatprep.subr.bf16.mxu1 %v837_v11 }
  0x1a   : > { %756 = vmatmul.mubr.msk.bf16.gmra.mrb[4].mxu0 %vm300_vm0, %v827_v8 }
  0x1b   : > { %759 = vmatprep.mubr.msk.bf16.mxu0 %vm300_vm0, %v828_v9  ;;  %772 = vmatpush3.bf16.msra.mxu0 %v834_v3 }
  0x1c   : > { %773 = vmatprep.subr.bf16.mxu0 %v835_v7  ;;  %812 = vmatpush3.bf16.msra.mxu1 %v837_v11 }
  0x1d   : > { %805 = vmatprep.subr.bf16.mxu1 %v838_v15 }
  0x1f   : > { %774 = vmatpush3.bf16.msra.mxu0 %v835_v7 }
  0x20   : > { %775 = vmatprep.subr.bf16.mxu0 %v836_v10  ;;  %813 = vmatpush3.bf16.msra.mxu1 %v838_v15 }
  0x21   : > { %806 = vmatprep.subr.bf16.mxu1 %v839_v16 }
  0x22   : > { %760 = vmatmul.mubr.msk.bf16.gmra.mrb[8].mxu0 %vm300_vm0, %v829_v12 }
  0x23   : > { %763 = vmatprep.mubr.msk.bf16.mxu0 %vm300_vm0, %v830_v13  ;;  %776 = vmatpush3.bf16.msra.mxu0 %v836_v10  ;;  %v713_v10 = vld [vmem:[%s972_s4] ss:$0 sm:$0xff] }
  0x24   : > { %777 = vmatprep.subr.bf16.mxu0 %v837_v11  ;;  %814 = vmatpush3.bf16.msra.mxu1 %v839_v16 }
  0x27   : > { %778 = vmatpush3.bf16.msra.mxu0 %v837_v11 }
  0x28   : > { %779 = vmatprep.subr.bf16.mxu0 %v838_v15 }
  0x2a   : > { %764 = vmatmul.mubr.msk.bf16.gmra.mrb[12].mxu0 %vm300_vm0, %v831_v14 }
  0x2b   : > { %780 = vmatpush3.bf16.msra.mxu0 %v838_v15 }
  0x2c   : > { %781 = vmatprep.subr.bf16.mxu0 %v839_v16 }
  0x2f   : > { %782 = vmatpush3.bf16.msra.mxu0 %v839_v16 }
  0xe5   : > { %v753_v18 = vpop.f32.mrb[0].mxu0 }
  0xe6   : > { %v368_v19 = vadd.f32 %v753_v18, %v695_v17  ;;  %v359_v20 = vpop.f32.mrb[1].mxu0 }
  0xe7   : > { %v360_v21 = vadd.f32 %v695_v17, %v359_v20  ;;  %v754_v22 = vpop.f32.mrb[2].mxu0 }
  0xe8   : > { %v371_v23 = vadd.f32 %v754_v22, %v695_v17  ;;  %v362_v24 = vpop.f32.mrb[3].mxu0  ;;  %v424_v26 = vmax.f32 %v368_v19, 0.0 }
  0xe9   : > { %v363_v25 = vadd.f32 %v695_v17, %v362_v24  ;;  %v422_v28 = vmax.f32 %v360_v21, 0.0 }
  0xea   : > { %v425_v27 = vmax.f32 %v371_v23, 0.0 }
  0xeb   : > { %v423_v29 = vmax.f32 %v363_v25, 0.0 }
  0xec   : > { %v439_v30 = vpack.c.bf16 %v425_v27, %v424_v26 }
  0xed   : > { %v438_v31 = vpack.c.bf16 %v423_v29, %v422_v28  ;;  %v757_v32 = vpop.f32.mrb[4].mxu0 }
  0xee   : > { %v384_v33 = vadd.f32 %v757_v32, %v695_v17  ;;  %v375_v34 = vpop.f32.mrb[5].mxu0 }
  0xef   : > { %v376_v35 = vadd.f32 %v695_v17, %v375_v34  ;;  %v758_v36 = vpop.f32.mrb[6].mxu0  ;;  %783 = vmatprep.mubr.bf16.mxu0 %v438_v31 }
  0xf0   : > { %v387_v37 = vadd.f32 %v758_v36, %v695_v17  ;;  %v378_v38 = vpop.f32.mrb[7].mxu0  ;;  %784 = vmatmul.mubr.bf16.vlgmr.msra.gmra.mrb[16].mxu0 %v439_v30  ;;  %v428_v40 = vmax.f32 %v384_v33, 0.0 }
  0xf1   : > { %v379_v39 = vadd.f32 %v695_v17, %v378_v38  ;;  %v426_v42 = vmax.f32 %v376_v35, 0.0 }
  0xf2   : > { %v429_v41 = vmax.f32 %v387_v37, 0.0 }
  0xf3   : > { %v427_v43 = vmax.f32 %v379_v39, 0.0 }
  0xf4   : > { %v441_v44 = vpack.c.bf16 %v429_v41, %v428_v40 }
  0xf5   : > { %v761_v45 = vpop.f32.mrb[8].mxu0  ;;  %v440_v46 = vpack.c.bf16 %v427_v43, %v426_v42 }
  0xf6   : > { %v400_v47 = vadd.f32 %v761_v45, %v695_v17  ;;  %v391_v48 = vpop.f32.mrb[9].mxu0 }
  0xf7   : > { %v392_v49 = vadd.f32 %v695_v17, %v391_v48  ;;  %v762_v50 = vpop.f32.mrb[10].mxu0  ;;  %787 = vmatprep.mubr.bf16.mxu1 %v440_v46 }
  0xf8   : > { %v403_v51 = vadd.f32 %v762_v50, %v695_v17  ;;  %v394_v52 = vpop.f32.mrb[11].mxu0  ;;  %788 = vmatmul.mubr.bf16.vlgmr.msra.gmra.mrb[0].mxu1 %v441_v44  ;;  %v432_v54 = vmax.f32 %v400_v47, 0.0 }
  0xf9   : > { %v395_v53 = vadd.f32 %v695_v17, %v394_v52  ;;  %v430_v56 = vmax.f32 %v392_v49, 0.0 }
  0xfa   : > { %v433_v55 = vmax.f32 %v403_v51, 0.0 }
  0xfb   : > { %v431_v57 = vmax.f32 %v395_v53, 0.0 }
  0xfc   : > { %v443_v58 = vpack.c.bf16 %v433_v55, %v432_v54 }
  0xfd   : > { %v442_v59 = vpack.c.bf16 %v431_v57, %v430_v56  ;;  %v765_v60 = vpop.f32.mrb[12].mxu0 }
  0xfe   : > { %v416_v61 = vadd.f32 %v765_v60, %v695_v17  ;;  %v407_v62 = vpop.f32.mrb[13].mxu0 }
  0xff   : > { %v408_v63 = vadd.f32 %v695_v17, %v407_v62  ;;  %v766_v0 = vpop.f32.mrb[14].mxu0  ;;  %791 = vmatprep.mubr.bf16.mxu1 %v442_v59 }
 0x100   : > { %v419_v1 = vadd.f32 %v766_v0, %v695_v17  ;;  %v410_v2 = vpop.f32.mrb[15].mxu0  ;;  %792 = vmatmul.mubr.bf16.gmra.mrb[4].mxu1 %v443_v58  ;;  %v436_v4 = vmax.f32 %v416_v61, 0.0 }
 0x101   : > { %v411_v3 = vadd.f32 %v695_v17, %v410_v2  ;;  %v434_v6 = vmax.f32 %v408_v63, 0.0 }
 0x102   : > { %v437_v5 = vmax.f32 %v419_v1, 0.0 }
 0x103   : > { %v435_v7 = vmax.f32 %v411_v3, 0.0 }
 0x104   : > { %v445_v8 = vpack.c.bf16 %v437_v5, %v436_v4 }
 0x105   : > { %v444_v9 = vpack.c.bf16 %v435_v7, %v434_v6 }
 0x107   : > { %795 = vmatprep.mubr.bf16.mxu1 %v444_v9 }
 0x108   : > { %796 = vmatmul.mubr.bf16.gmra.mrb[8].mxu1 %v445_v8 }
 0x1c3   : > { %v785_v11 = vpop.f32.mrb[16].mxu0 }
 0x1c4   : > { %v560_v12 = vadd.f32 %v785_v11, %v713_v10  ;;  %v551_v13 = vpop.f32.mrb[17].mxu0 }
 0x1c5   : > { %v552_v14 = vadd.f32 %v713_v10, %v551_v13  ;;  %v786_v15 = vpop.f32.mrb[18].mxu0 }
 0x1c6   : > { %616 = vst [vmem:[%s947_s27 + $0x10] sm:$0xff] %v560_v12  ;;  %v563_v16 = vadd.f32 %v786_v15, %v713_v10  ;;  %v554_v17 = vpop.f32.mrb[19].mxu0 }
 0x1c7   : > { %614 = vst [vmem:[%s947_s27] sm:$0xff] %v552_v14  ;;  %v555_v18 = vadd.f32 %v713_v10, %v554_v17 }
 0x1c8   : > { %617 = vst [vmem:[%s947_s27 + $0x18] sm:$0xff] %v563_v16 }
 0x1c9   : > { %615 = vst [vmem:[%s947_s27 + $0x8] sm:$0xff] %v555_v18 }
 0x1cb   : > { %v789_v19 = vpop.f32.mrb[0].mxu1 }
 0x1cc   : > { %v576_v20 = vadd.f32 %v789_v19, %v713_v10  ;;  %v567_v21 = vpop.f32.mrb[1].mxu1 }
 0x1cd   : > { %v568_v22 = vadd.f32 %v713_v10, %v567_v21  ;;  %v790_v23 = vpop.f32.mrb[2].mxu1 }
 0x1ce   : > { %620 = vst [vmem:[%s947_s27 + $0x30] sm:$0xff] %v576_v20  ;;  %v579_v24 = vadd.f32 %v790_v23, %v713_v10  ;;  %v570_v25 = vpop.f32.mrb[3].mxu1 }
 0x1cf   : > { %618 = vst [vmem:[%s947_s27 + $0x20] sm:$0xff] %v568_v22  ;;  %v571_v26 = vadd.f32 %v713_v10, %v570_v25 }
 0x1d0   : > { %621 = vst [vmem:[%s947_s27 + $0x38] sm:$0xff] %v579_v24 }
 0x1d1   : > { %619 = vst [vmem:[%s947_s27 + $0x28] sm:$0xff] %v571_v26 }
 0x1d3   : > { %v793_v27 = vpop.f32.mrb[4].mxu1 }
 0x1d4   : > { %v592_v28 = vadd.f32 %v793_v27, %v713_v10  ;;  %v583_v29 = vpop.f32.mrb[5].mxu1 }
 0x1d5   : > { %v584_v30 = vadd.f32 %v713_v10, %v583_v29  ;;  %v794_v31 = vpop.f32.mrb[6].mxu1 }
 0x1d6   : > { %624 = vst [vmem:[%s947_s27 + $0x50] sm:$0xff] %v592_v28  ;;  %v595_v32 = vadd.f32 %v794_v31, %v713_v10  ;;  %v586_v33 = vpop.f32.mrb[7].mxu1 }
 0x1d7   : > { %622 = vst [vmem:[%s947_s27 + $0x40] sm:$0xff] %v584_v30  ;;  %v587_v34 = vadd.f32 %v713_v10, %v586_v33 }
 0x1d8   : > { %625 = vst [vmem:[%s947_s27 + $0x58] sm:$0xff] %v595_v32 }
 0x1d9   : > { %623 = vst [vmem:[%s947_s27 + $0x48] sm:$0xff] %v587_v34 }
 0x1db   : > { %v797_v35 = vpop.f32.mrb[8].mxu1 }
 0x1dc   : > { %v608_v36 = vadd.f32 %v797_v35, %v713_v10  ;;  %v599_v37 = vpop.f32.mrb[9].mxu1 }
 0x1dd   : > { %v600_v38 = vadd.f32 %v713_v10, %v599_v37  ;;  %v798_v39 = vpop.f32.mrb[10].mxu1 }
 0x1de   : > { %628 = vst [vmem:[%s947_s27 + $0x70] sm:$0xff] %v608_v36  ;;  %v611_v40 = vadd.f32 %v798_v39, %v713_v10  ;;  %v602_v41 = vpop.f32.mrb[11].mxu1 }
 0x1df   : > { %626 = vst [vmem:[%s947_s27 + $0x60] sm:$0xff] %v600_v38  ;;  %v603_v42 = vadd.f32 %v713_v10, %v602_v41 }
 0x1e0   : > { %629 = vst [vmem:[%s947_s27 + $0x78] sm:$0xff] %v611_v40 }
 0x1e1   : > { %627 = vst [vmem:[%s947_s27 + $0x68] sm:$0xff] %v603_v42 }
 0x1e2 PF: > { %s15_s18 = sadd.s32 1, %s846_s18  }
 0x1e3   : > { %p12_p4 = scmp.ge.s32.totalorder %s15_s18, 4  }
 0x1e5   :  { %14 = sbr.rel (!%p12_p4) target bundleno = 1 (0x1), region = 70 }

</bundles_post_ra>
